<compile_context>
chip_gen: v6e
topology: v6e:2x2x1
jax: 0.10.0
libtpu: 0.0.40
codegen_flags: <defaults>
</compile_context>

<pallas_src>
import functools
import itertools
from typing import List, Tuple

import jax
import jax.numpy as jnp
from jax.experimental import pallas as pl
from jax.experimental.pallas import tpu as pltpu


def _make_mean_junction_kernel(n_branches, branch_flat, out_flat, f_blk):
    inv = 1.0 / float(n_branches)
    needs_mask = any(fb < out_flat for fb in branch_flat)

    def kernel(y_ref, *rest):
        x_refs = rest[:n_branches]
        o_ref = rest[n_branches]

        if needs_mask:
            # Hoisted once per grid step: absolute flat (= channel*HW + spatial)
            # coordinate of every lane in this block.  Per-branch masking below
            # is then just a compare against a scalar + select (broadcast over
            # the batch sublanes).
            j = pl.program_id(1)
            flat_pos = j * f_blk + jax.lax.broadcasted_iota(
                jnp.int32, (1, f_blk), 1)

        s = None
        for b in range(n_branches):
            xb = x_refs[b][...].astype(jnp.float32)
            if branch_flat[b] < out_flat:
                # Channels this branch does not have behave as zeros
                # (F.pad(x, (0,0,0,0,0,p))), applied in-register — no padded
                # copy ever hits HBM.
                xb = jnp.where(flat_pos < branch_flat[b], xb, jnp.float32(0.0))
            s = xb if s is None else s + xb
        if n_branches > 1:
            s = s * jnp.float32(inv)  # mean over stacked inbounds
        o_ref[...] = (y_ref[...].astype(jnp.float32) + s).astype(o_ref.dtype)

    return kernel


@functools.lru_cache(maxsize=None)
def _chip_plan():
    """(vmem_limit_bytes, min_grid_steps) chosen per TPU generation."""
    try:
        cap = int(pltpu.get_tpu_info().vmem_capacity_bytes)
    except Exception:
        cap = 64 * 1024 * 1024  # unknown -> assume the smallest (v7x-class) VMEM
    if cap <= 64 * 1024 * 1024:
        # v7x: 64 MiB VMEM per TensorCore.  Keep the total footprint well under
        # it, and ask for >=4 grid steps so both cores get work and the
        # prefetch pipeline overlaps.
        return 48 * 1024 * 1024, 4
    # v5e / v6e: 128 MiB physical VMEM -> raise the scoped limit well past the
    # 16/32 MiB defaults; >=2 steps is enough (one TensorCore per chip).
    return 64 * 1024 * 1024, 2


@functools.lru_cache(maxsize=None)
def _build_junction_fn(out_shape, dtype_name, branch_channels):
    N, C, H, W = out_shape
    HW = H * W
    flat = C * HW
    dtype = jnp.dtype(dtype_name)
    itemsize = dtype.itemsize
    n_br = len(branch_channels)
    branch_flat = tuple(cb * HW for cb in branch_channels)

    vmem_limit, min_steps = _chip_plan()

    # VMEM plan: (y + branches + out) streams, each double-buffered, plus a few
    # block-sized f32 temporaries the compiler materializes for the elementwise
    # chain.  Size blocks so the total nearly fills the scoped limit.
    n_streams = n_br + 2
    denom = 2 * n_streams + 4 * max(1, 4 // itemsize)
    budget = vmem_limit - 4 * 1024 * 1024
    per_block = max(128 * itemsize, budget // denom)   # bytes per block

    LANE = 128
    min_f = flat if flat < LANE else LANE

    # Batch blocking: keep the whole batch inside a block (sublane dim == full
    # batch extent) unless it cannot even fit a single 128-lane tile.
    n_blk = N
    if N * min_f * itemsize > per_block:
        cand = max(1, per_block // (min_f * itemsize))
        if cand >= 8:
            cand = cand // 8 * 8
        n_blk = min(N, cand)

    # Flat (= channel*spatial) blocking: as large as the budget allows, kept a
    # multiple of 128 lanes so output stores are unmasked (lane-dense).
    f_blk = per_block // max(1, n_blk * itemsize)
    if f_blk >= flat:
        f_blk = flat
    else:
        f_blk = max(min_f, (f_blk // LANE) * LANE)

    # Guarantee enough grid steps for megacore sharding + DMA/compute overlap
    # (>=4 on v7x, >=2 on v5e/v6e), splitting only the lane-aligned flat axis.
    while pl.cdiv(N, n_blk) * pl.cdiv(flat, f_blk) < min_steps and f_blk > LANE:
        f_blk = max(LANE, (f_blk // 2) // LANE * LANE)

    # NOTE: the flat axis MUST stay innermost (grid axis 1); the clamped branch
    # index_map relies on consecutive identical block indices so Pallas skips
    # the redundant re-DMA of a short branch's last block.
    grid = (pl.cdiv(N, n_blk), pl.cdiv(flat, f_blk))
    gf = grid[1]
    block = (n_blk, f_blk)

    def out_map(i, j):
        return (i, j)

    in_specs = [pl.BlockSpec(block, out_map)]  # y
    for fb in branch_flat:
        nb_b = pl.cdiv(fb, f_blk)
        if nb_b >= gf:
            idx_map = out_map
        else:
            # Short branch: clamp so we never request a block past its extent;
            # the kernel masks the stale/garbage lanes to zero.
            idx_map = (lambda i, j, _last=nb_b - 1: (i, jnp.minimum(j, _last)))
        in_specs.append(pl.BlockSpec(block, idx_map))

    kernel = _make_mean_junction_kernel(n_br, branch_flat, flat, f_blk)

    bytes_accessed = (2 * flat + sum(branch_flat)) * N * itemsize  # y + out + branches
    cost = pl.CostEstimate(flops=(n_br + 1) * N * flat,
                           transcendentals=0,
                           bytes_accessed=bytes_accessed)

    call = pl.pallas_call(
        kernel,
        out_shape=jax.ShapeDtypeStruct((N, flat), dtype),
        grid=grid,
        in_specs=in_specs,
        out_specs=pl.BlockSpec(block, out_map),
        compiler_params=pltpu.CompilerParams(
            dimension_semantics=("parallel", "parallel"),
            vmem_limit_bytes=vmem_limit,
        ),
        cost_estimate=cost,
    )

    @jax.jit
    def fn(y, *xs):
        y2 = y.reshape(N, flat)
        xs2 = [xi.reshape(N, xi.shape[1] * HW) for xi in xs]
        out = call(y2, *xs2)
        return out.reshape(N, C, H, W)

    return fn


class MeanJunction:
    """Pure-Python / Pallas re-implementation of the PyTorch MeanJunction."""

    def __init__(self, index: int, settings: List[Tuple[int, int, int]], **kwargs) -> None:
        for i in range(index, -1, -1):
            start_index = i
            if settings[i][2] != 1:
                break
        inbounds = [index]
        for i in itertools.count():
            inbound_index = index - 2 ** (i + 1) + 1
            if inbound_index < start_index:
                break
            inbounds.append(inbound_index)
        self.index = index
        self.inbounds = inbounds
        self.channels = settings[index][1]
        self.paddings = [settings[index][1] - settings[i][1] for i in inbounds]

    def __call__(self, y: jnp.ndarray, x: List[jnp.ndarray]) -> jnp.ndarray:
        N, C, H, W = y.shape
        assert C == self.channels
        xs = [x[i] for i in self.inbounds]
        branch_channels = tuple(int(xi.shape[1]) for xi in xs)
        fn = _build_junction_fn((N, C, H, W), str(y.dtype), branch_channels)
        return fn(y, *xs)


def _reference(junction: MeanJunction, y, x):
    xs = []
    for i, p in zip(junction.inbounds, junction.paddings):
        xi = x[i]
        if p != 0:
            xi = jnp.pad(xi, ((0, 0), (0, p), (0, 0), (0, 0)))
        xs.append(xi)
    if len(xs) == 1:
        return y + xs[0]
    return y + jnp.stack(xs, axis=1).mean(axis=1)


if __name__ == "__main__":
    # settings[i] = (kernel_size, channels, stride). Stride-2 at i=0 makes
    # start_index=0, so for index=3: inbounds=[3, 2, 0], paddings=[0, 2, 4].
    settings = [(3, 4, 2), (3, 4, 1), (3, 6, 1), (3, 8, 1)]
    index = 3
    junction = MeanJunction(index, settings)

    N, H, W = 2, 16, 16
    key = jax.random.PRNGKey(0)
    keys = jax.random.split(key, len(settings) + 1)

    # One feature map per stage, channel counts taken from `settings`.
    x = [
        jax.random.normal(keys[i], (N, settings[i][1], H, W), dtype=jnp.float32)
        for i in range(len(settings))
    ]
    y = jax.random.normal(keys[-1], (N, settings[index][1], H, W), dtype=jnp.float32)

    out = jax.block_until_ready(junction(y, x))
    ref = _reference(junction, y, x)
    assert out.shape == (N, settings[index][1], H, W)
    assert jnp.allclose(out, ref, atol=1e-5, rtol=1e-5)

    # Second config: single inbound (stride-2 at the junction itself), no mean.
    settings2 = [(3, 4, 2), (3, 8, 2)]
    junction2 = MeanJunction(1, settings2)
    x2 = [
        jax.random.normal(keys[i], (N, settings2[i][1], H, W), dtype=jnp.float32)
        for i in range(len(settings2))
    ]
    y2 = jax.random.normal(keys[-1], (N, settings2[1][1], H, W), dtype=jnp.float32)
    out2 = jax.block_until_ready(junction2(y2, x2))
    ref2 = _reference(junction2, y2, x2)
    assert jnp.allclose(out2, ref2, atol=1e-5, rtol=1e-5)

    print("KERNEL_OK")
</pallas_src>

<mosaic_0001>
module attributes {stable_mosaic.version = 11 : i64} {
  func.func @kernel(%arg0: i32, %arg1: i32, %arg2: memref<2x512xf32, #tpu.memory_space<vmem>>, %arg3: memref<2x512xf32, #tpu.memory_space<vmem>>, %arg4: memref<2x512xf32, #tpu.memory_space<vmem>>, %arg5: memref<2x512xf32, #tpu.memory_space<vmem>>, %arg6: memref<2x512xf32, #tpu.memory_space<vmem>>) attributes {dimension_semantics = [#tpu.dimension_semantics<parallel>, #tpu.dimension_semantics<parallel>], iteration_bounds = array<i64: 1, 4>, scalar_prefetch = 0 : i64, scratch_operands = 0 : i64, tpu.core_type = #tpu.core_type<tc>, window_params = [{transform_indices = @transform_0, window_bounds = array<i64: 2, 512>}, {transform_indices = @transform_1, window_bounds = array<i64: 2, 512>}, {transform_indices = @transform_2, window_bounds = array<i64: 2, 512>}, {transform_indices = @transform_3, window_bounds = array<i64: 2, 512>}, {transform_indices = @transform_4, window_bounds = array<i64: 2, 512>}]} {
    %c512_i32 = arith.constant 512 : i32
    %0 = arith.muli %arg1, %c512_i32 : i32
    %1 = tpu.iota {dimensions = array<i32: 1>} : vector<1x512xi32>
    %2 = vector.broadcast %0 : i32 to vector<1x512xi32>
    %3 = arith.addi %2, %1 : vector<1x512xi32>
    %c0 = arith.constant 0 : index
    %c0_0 = arith.constant 0 : index
    %4 = vector.load %arg3[%c0, %c0_0] : memref<2x512xf32, #tpu.memory_space<vmem>>, vector<2x512xf32>
    %c0_1 = arith.constant 0 : index
    %c0_2 = arith.constant 0 : index
    %5 = vector.load %arg4[%c0_1, %c0_2] : memref<2x512xf32, #tpu.memory_space<vmem>>, vector<2x512xf32>
    %c1536_i32 = arith.constant 1536 : i32
    %6 = vector.broadcast %c1536_i32 : i32 to vector<1x512xi32>
    %7 = arith.cmpi slt, %3, %6 : vector<1x512xi32>
    %cst = arith.constant 0.000000e+00 : f32
    %8 = vector.shape_cast %7 : vector<1x512xi1> to vector<1x512xi1>
    %9 = vector.broadcast %8 : vector<1x512xi1> to vector<2x512xi1>
    %10 = vector.broadcast %cst : f32 to vector<2x512xf32>
    %11 = arith.select %9, %5, %10 : vector<2x512xi1>, vector<2x512xf32>
    %12 = arith.addf %4, %11 : vector<2x512xf32>
    %c0_3 = arith.constant 0 : index
    %c0_4 = arith.constant 0 : index
    %13 = vector.load %arg5[%c0_3, %c0_4] : memref<2x512xf32, #tpu.memory_space<vmem>>, vector<2x512xf32>
    %c1024_i32 = arith.constant 1024 : i32
    %14 = vector.broadcast %c1024_i32 : i32 to vector<1x512xi32>
    %15 = arith.cmpi slt, %3, %14 : vector<1x512xi32>
    %cst_5 = arith.constant 0.000000e+00 : f32
    %16 = vector.shape_cast %15 : vector<1x512xi1> to vector<1x512xi1>
    %17 = vector.broadcast %16 : vector<1x512xi1> to vector<2x512xi1>
    %18 = vector.broadcast %cst_5 : f32 to vector<2x512xf32>
    %19 = arith.select %17, %13, %18 : vector<2x512xi1>, vector<2x512xf32>
    %20 = arith.addf %12, %19 : vector<2x512xf32>
    %cst_6 = arith.constant 0.333333343 : f32
    %21 = vector.broadcast %cst_6 : f32 to vector<2x512xf32>
    %22 = arith.mulf %20, %21 : vector<2x512xf32>
    %c0_7 = arith.constant 0 : index
    %c0_8 = arith.constant 0 : index
    %23 = vector.load %arg2[%c0_7, %c0_8] : memref<2x512xf32, #tpu.memory_space<vmem>>, vector<2x512xf32>
    %24 = arith.addf %23, %22 : vector<2x512xf32>
    %c0_9 = arith.constant 0 : index
    %c0_10 = arith.constant 0 : index
    %25 = vector.load %arg6[%c0_9, %c0_10] : memref<2x512xf32, #tpu.memory_space<vmem>>, vector<2x512xf32>
    tpu.vector_store %arg6[%c0_9, %c0_10], %24 {strides = array<i32>} : memref<2x512xf32, #tpu.memory_space<vmem>>, vector<2x512xf32>,
    return
  }
  func.func @transform_0(%arg0: i32, %arg1: i32) -> (i32, i32) {
    %c0_i32 = arith.constant 0 : i32
    return %arg0, %arg1 : i32, i32
  }
  func.func @transform_1(%arg0: i32, %arg1: i32) -> (i32, i32) {
    %c0_i32 = arith.constant 0 : i32
    return %arg0, %arg1 : i32, i32
  }
  func.func @transform_2(%arg0: i32, %arg1: i32) -> (i32, i32) {
    %c2_i32 = arith.constant 2 : i32
    %0 = arith.minsi %arg1, %c2_i32 : i32
    %c0_i32 = arith.constant 0 : i32
    return %arg0, %0 : i32, i32
  }
  func.func @transform_3(%arg0: i32, %arg1: i32) -> (i32, i32) {
    %c1_i32 = arith.constant 1 : i32
    %0 = arith.minsi %arg1, %c1_i32 : i32
    %c0_i32 = arith.constant 0 : i32
    return %arg0, %0 : i32, i32
  }
  func.func @transform_4(%arg0: i32, %arg1: i32) -> (i32, i32) {
    %c0_i32 = arith.constant 0 : i32
    return %arg0, %arg1 : i32, i32
  }
}

</mosaic_0001>

<bundles_post_ra>
// kernel: fn.1
= control target key start
LH: loop header
LB: loop body
LE: loop exit
PB: predicated region body
PF: predicated region fallthrough
CT: control target
= control target key end

     0   :  { %s749_s15 = smov 0   ;;  %s751_s16 = smov 0   ;;  %s810_s0 = inlined_call_operand.vmem [shape: f32[2,2048], index: 0, kind: input, shape index: {}]   ;;  %s811_s1 = inlined_call_operand.vmem [shape: f32[2,2048], index: 1, kind: input, shape index: {}]   ;;  %s812_s2 = inlined_call_operand.vmem [shape: f32[2,1536], index: 2, kind: input, shape index: {}]   ;;  %s813_s3 = inlined_call_operand.vmem [shape: f32[2,1024], index: 3, kind: input, shape index: {}]   ;;  %s814_s4 = inlined_call_operand.vmem [shape: f32[2,2048], index: 4, kind: output, shape index: {}]  }
   0x1   :  { %s753_s17 = smov 0  }
   0x2 LB: > { %s23_s18 = sadd.s32 1, %s717_s16  ;;  %p658_p0 = scmp.ge.s32.totalorder %s721_s17, 1  ;;  %s721_s17 = sphi %s753_s17, %s14_s17   ;;  %s717_s16 = sphi %s751_s16, %s817_s16   ;;  %s713_s15 = sphi %s749_s15, %s816_s15  }
   0x3   : > { %p24_p1 = scmp.ge.s32.totalorder %s23_s18, 4  ;;  %p250_p2 = scmp.lt.s32.totalorder %s721_s17, 5 }
   0x5   : > { %s819_s18 = smov (%p24_p1, %s23_s18), 0  ;;  %p251_p3 = pnand %p658_p0, %p250_p2 }
   0x6   : > { %p335_p4 = scmp.lt.s32.totalorder (!%p251_p3), %s713_s15, 2  ;;  %p349_p5 = scmp.lt.s32.totalorder (!%p251_p3), %s713_s15, 1 }
   0x7   : > { %254 = sbr.rel (%p251_p3) target bundleno = 43 (0x2b), region = 36  ;;  %s669_s21 = sshll.u32 (!%p251_p3), %s713_s15, 9 }
   0x8   : > { %s659_s22 = sshll.u32 (!%p251_p3), %s713_s15, 2 }
   0x9   : > { %p775_p7 = scmp.lt.s32.totalorder (!%p251_p3), %s659_s22, 15 }
   0xc   : > { %v374_v0 = vlaneseq  ;;  %v723_v1 = vmov 1983009808   ;;  %s336_s19 = scalar_select %p335_p4, %s713_s15, 2  ;;  %v379_v8 = vstv %s669_s21 }
   0xd   : > { %v401_v2 = vunpack.c.l.s4 %v723_v1  ;;  %s823_s15 = smov (!%p349_p5, %s713_s15), 1  ;;  %s827_s22 = smov (!%p775_p7, %s659_s22), 15 }
   0xe   : > { %v375_v3 = vand.u32 127, %v374_v0  ;;  %s663_s20 = sshll.u32 %s336_s19, 2  ;;  %v404_v5 = vshrl.u32 %v374_v0, 7  ;;  %s665_s28 = sshll.u32 %s823_s15, 2 }
   0xf   : > { %v402_v4 = vunpack.c.0.s8 %v401_v2  ;;  %p340_p6 = scmp.lt.s32.totalorder %s663_s20, 11  ;;  %p354_p8 = scmp.lt.s32.totalorder %s665_s28, 7 }
  0x10   : > { %v376_v6 = vadd.s32 128, %v375_v3  ;;  %v377_v7 = vadd.s32 256, %v375_v3  ;;  %v378_v9 = vadd.s32 384, %v375_v3  ;;  %v380_v10 = vadd.s32 %v379_v8, %v375_v3  ;;  %s787_s7 = sshll.u32 %s827_s22, 1 }
  0x11   : > { %s821_s20 = smov (!%p340_p6, %s663_s20), 11  ;;  %v405_v11 = vsub.s32 %v402_v4, %v404_v5  ;;  %s825_s28 = smov (!%p354_p8, %s665_s28), 7 }
  0x12   : > { %s664_s24 = sshll.u32 %s821_s20, 1  ;;  %v381_v12 = vadd.s32 %v379_v8, %v376_v6  ;;  %v382_v13 = vadd.s32 %v379_v8, %v377_v7  ;;  %v383_v14 = vadd.s32 %v379_v8, %v378_v9  ;;  %vm386_vm0 = vcmp.lt.s32.totalorder %v380_v10, 1536  ;;  %s666_s29 = sshll.u32 %s825_s28, 1 }
  0x13   : > { %s345_s27 = scalar_lea.vmem %s812_s2, %s664_s24  ;;  %s359_s6 = scalar_lea.vmem %s813_s3, %s666_s29  ;;  %vm448_vm4 = vcmp.lt.s32.totalorder %v380_v10, 1024 }
  0x14   : > { %v385_v15 = vld [vmem:[%s345_s27] sm:$0xff]  ;;  %vm387_vm1 = vcmp.lt.s32.totalorder %v381_v12, 1536  ;;  %vm388_vm2 = vcmp.lt.s32.totalorder %v382_v13, 1536  ;;  %vm389_vm3 = vcmp.lt.s32.totalorder %v383_v14, 1536  ;;  %vm449_vm5 = vcmp.lt.s32.totalorder %v381_v12, 1024  ;;  %s333_s10 = scalar_lea.vmem %s811_s1, %s787_s7  ;;  %s323_s13 = scalar_lea.vmem %s810_s0, %s787_s7 }
  0x15   : > { %v399_v16 = vcombine.high %v385_v15, %v385_v15  ;;  %v406_v17 = vrot.slane %v385_v15, %v405_v11  ;;  %v447_v25 = vld [vmem:[%s359_s6] sm:$0xff]  ;;  %vm450_vm6 = vcmp.lt.s32.totalorder %v382_v13, 1024  ;;  %vm451_vm7 = vcmp.lt.s32.totalorder %v383_v14, 1024  ;;  %s371_s19 = scalar_lea.vmem %s814_s4, %s787_s7 }
  0x16   : > { %v461_v27 = vcombine.high %v447_v25, %v447_v25  ;;  %v468_v28 = vrot.slane %v447_v25, %v405_v11  ;;  %v384_v40 = vld [vmem:[%s333_s10] sm:$0xff] }
  0x17   : > { %v413_v18 = vrot.slane %v399_v16, %v405_v11  ;;  %v414_v19 = vcombine.high %v406_v17, %v406_v17  ;;  %v420_v20 = vsel %vm386_vm0, %v406_v17, 0.0  ;;  %v510_v48 = vld [vmem:[%s323_s13] sm:$0xff] }
  0x18   : > { %v475_v31 = vrot.slane %v461_v27, %v405_v11  ;;  %v476_v32 = vcombine.high %v468_v28, %v468_v28  ;;  %v482_v33 = vsel %vm448_vm4, %v468_v28, 0.0 }
  0x19   : > { %v415_v21 = vcombine.high %v413_v18, %v413_v18  ;;  %v421_v22 = vsel %vm387_vm1, %v414_v19, 0.0  ;;  %v422_v23 = vsel %vm388_vm2, %v413_v18, 0.0 }
  0x1a   : > { %v428_v24 = vcombine.low %v420_v20, %v421_v22  ;;  %v477_v35 = vcombine.high %v475_v31, %v475_v31  ;;  %v483_v36 = vsel %vm449_vm5, %v476_v32, 0.0  ;;  %v484_v37 = vsel %vm450_vm6, %v475_v31, 0.0 }
  0x1b   : > { %v423_v26 = vsel %vm389_vm3, %v415_v21, 0.0  ;;  %v490_v39 = vcombine.low %v482_v33, %v483_v36 }
  0x1c   : > { %v429_v29 = vcombine.low %v422_v23, %v423_v26  ;;  %v436_v30 = vrot.slane %v428_v24, %v405_v11  ;;  %v485_v41 = vsel %vm451_vm7, %v477_v35, 0.0 }
  0x1d   : > { %v491_v42 = vcombine.low %v484_v37, %v485_v41  ;;  %v498_v43 = vrot.slane %v490_v39, %v405_v11 }
  0x1e   : > { %v443_v34 = vrot.slane %v429_v29, %v405_v11 }
  0x1f   : > { %v505_v45 = vrot.slane %v491_v42, %v405_v11 }
  0x20   : > { %v444_v38 = vcombine.low %v436_v30, %v443_v34 }
  0x21   : > { %v506_v46 = vcombine.low %v498_v43, %v505_v45 }
  0x22   : > { %v446_v44 = vadd.f32 %v444_v38, %v384_v40 }
  0x24   : > { %v508_v47 = vadd.f32 %v506_v46, %v446_v44 }
  0x26   : > { %v509_v49 = vmul.f32 0.33333334, %v508_v47 }
  0x28   : > { %v511_v50 = vadd.f32 %v510_v48, %v509_v49 }
  0x2a   : > { %512 = vst [vmem:[%s371_s19] sm:$0xff] %v511_v50 }
  0x2b PF: > { %s14_s17 = sadd.s32 1, %s721_s17   ;;  %s816_s15 = smov %s717_s16 }
  0x2c   : > { %p11_p9 = scmp.ge.s32.totalorder %s14_s17, 6   ;;  %s817_s16 = smov %s819_s18 }
  0x2e   :  { %13 = sbr.rel (!%p11_p9) target bundleno = 2 (0x2), region = 75 }

</bundles_post_ra>
